<compile_context>
chip_gen: v6e
topology: v6e:2x2x1
jax: 0.10.0
libtpu: 0.0.40
codegen_flags: <defaults>
</compile_context>

<pallas_src>
import jax
import jax.numpy as jnp
import numpy as np
from jax.experimental import pallas as pl
from jax.experimental.pallas import tpu as pltpu

NUM_CLASSES = 8
C_IN = 30
C1, K1, S1 = 64, 7, 3
C2, K2, S2 = 128, 5, 3
FC1 = 64
BN_EPS = 1e-5

# lane-dense padded sizes (multiples of 128 on every matmul operand edge)
KC1_PAD = 256     # K1 * C_IN = 210 -> 256   (conv1 contraction dim)
C1_PAD = 128      # conv1 output channels 64 -> 128
FC1_PAD = 128     # fc1 width 64 -> 128
OUT_PAD = 128     # logits 8 -> 128 (padded logits get -1e30 bias)
NEG_BIG = -1e30


# ------------------------------ fused kernel -------------------------------- #

def _fused_forward_kernel(p1_ref, sel_ref, w1_ref, b1_ref, w2_ref, b2_ref,
                          fc1w_ref, fc1b_ref, fc2w_ref, fc2b_ref, o_ref):
  # conv1 (im2col matmul) + folded BN1 + ReLU.
  #   p1: (B*L1, 256) bf16, w1: (256, 128) bf16, b1: (1, 128) f32
  h1 = jnp.dot(p1_ref[...], w1_ref[...], preferred_element_type=jnp.float32)
  h1 = jnp.maximum(h1 + b1_ref[...], 0.0)                      # f32 epilogue

  # conv2 + folded BN2 + AdaptiveAvgPool1d(1), factored over the K2 taps:
  #   pooled[b, :] = sum_j (Sel_j @ h1) @ (W2_tap_j / L2) + b2
  # Sel_j is a {0,1} (B, B*L1) selection matrix (1/L2 folded into W2), so no
  # in-kernel strided slices or reshapes are needed.
  k2 = sel_ref.shape[0]
  batch = sel_ref.shape[1]
  c2 = w2_ref.shape[2]
  acc = jnp.zeros((batch, c2), jnp.float32)
  for j in range(k2):                                          # K2 = 5, unrolled
    a_j = jnp.dot(sel_ref[j], h1, preferred_element_type=jnp.float32)   # (B, 128)
    acc = acc + jnp.dot(a_j.astype(jnp.bfloat16), w2_ref[j],
                        preferred_element_type=jnp.float32)             # (B, 128)
  pooled = acc + b2_ref[...]

  # fc1 -> (nn.Dropout(0.2) == identity at inference) -> fc2 -> softmax(dim=1)
  z1 = jnp.dot(pooled.astype(jnp.bfloat16), fc1w_ref[...],
               preferred_element_type=jnp.float32) + fc1b_ref[...]      # (B, 128)
  z2 = jnp.dot(z1.astype(jnp.bfloat16), fc2w_ref[...],
               preferred_element_type=jnp.float32) + fc2b_ref[...]      # (B, 128)
  m = jnp.max(z2, axis=1, keepdims=True)        # padded logits are -1e30 -> ignored
  e = jnp.exp(z2 - m)
  inv = pl.reciprocal(jnp.sum(e, axis=1, keepdims=True), approx=True)
  o_ref[...] = e * inv


# --------------------------- hoisted preprocessing -------------------------- #

def _fold_bn(w, b, gamma, beta, mean, var, eps=BN_EPS):
  # Fold eval-mode BatchNorm1d into the conv: y = conv(x) * scale + bias_eff
  # w: (Cout, Cin, K) torch layout, b: (Cout,)
  scale = gamma / jnp.sqrt(var + eps)
  return w * scale[:, None, None], (b - mean) * scale + beta


def prepare_params(p, batch, seq_len):
  """One-time parameter preprocessing (BN fold, transpose, pad, bf16 cast)."""
  l1 = (seq_len - K1) // S1 + 1
  l2 = (l1 - K2) // S2 + 1

  # conv1 + BN1 -> (K1*C_IN, C1) flattened (tap-major, channel-minor), padded.
  w1f, b1f = _fold_bn(p['w1'], p['b1'], p['g1'], p['be1'], p['m1'], p['v1'])
  w1m = jnp.transpose(w1f, (2, 1, 0)).reshape(K1 * C_IN, C1)
  w1m = jnp.zeros((KC1_PAD, C1_PAD), jnp.float32).at[:K1 * C_IN, :C1].set(w1m)
  b1m = jnp.zeros((1, C1_PAD), jnp.float32).at[0, :C1].set(b1f)

  # conv2 + BN2 -> per-tap weights (K2, C1_PAD, C2); 1/L2 (pool mean) folded in.
  w2f, b2f = _fold_bn(p['w2'], p['b2'], p['g2'], p['be2'], p['m2'], p['v2'])
  w2tap = jnp.transpose(w2f, (2, 1, 0)) / float(l2)                    # (K2, 64, 128)
  w2tap = jnp.zeros((K2, C1_PAD, C2), jnp.float32).at[:, :C1, :].set(w2tap)
  b2m = b2f[None, :].astype(jnp.float32)                               # (1, 128)

  # fc1 / fc2 transposed to (in, out) and zero-padded to 128-lane slabs.
  fc1w = jnp.zeros((C2, FC1_PAD), jnp.float32).at[:, :FC1].set(p['fc1w'].T)
  fc1b = jnp.zeros((1, FC1_PAD), jnp.float32).at[0, :FC1].set(p['fc1b'])
  fc2w = jnp.zeros((FC1_PAD, OUT_PAD), jnp.float32)
  fc2w = fc2w.at[:FC1, :NUM_CLASSES].set(p['fc2w'].T)
  fc2b = jnp.full((1, OUT_PAD), NEG_BIG, jnp.float32)
  fc2b = fc2b.at[0, :NUM_CLASSES].set(p['fc2b'])

  # {0,1} selection matrices realizing "conv2 tap j + mean over L2 positions".
  sel = np.zeros((K2, batch, batch * l1), np.float32)
  for j in range(K2):
    for b in range(batch):
      for t in range(l2):
        sel[j, b, b * l1 + S2 * t + j] = 1.0

  return dict(
      w1=w1m.astype(jnp.bfloat16), b1=b1m,
      w2=w2tap.astype(jnp.bfloat16), b2=b2m,
      fc1w=fc1w.astype(jnp.bfloat16), fc1b=fc1b,
      fc2w=fc2w.astype(jnp.bfloat16), fc2b=fc2b,
      sel=jnp.asarray(sel),
  )


# ------------------------------- forward pass -------------------------------- #

def _im2col_strided(x, k, s):
  # x: (B, L, C) -> (B, Lout, k*C) with patch[b, t, j*C + c] = x[b, s*t + j, c]
  # built from k strided slices + concat (no gather).
  b, l, c = x.shape
  lout = (l - k) // s + 1
  cols = [x[:, j:j + s * (lout - 1) + 1:s, :] for j in range(k)]
  return jnp.concatenate(cols, axis=-1), lout


@jax.jit
def network_forward(x, prep):
  # x: (B, F, D).  The torch forward's transpose(-1, -2) makes D=30 the channel
  # axis and F the time axis, i.e. channels-last (B, time=F, channels=D) is x.
  batch, _, _ = x.shape
  patches1, l1 = _im2col_strided(x.astype(jnp.float32), K1, S1)   # (B, L1, 210)
  p1 = jnp.pad(patches1.reshape(batch * l1, K1 * C_IN),
               ((0, 0), (0, KC1_PAD - K1 * C_IN))).astype(jnp.bfloat16)

  vmem = pl.BlockSpec(memory_space=pltpu.MemorySpace.VMEM)
  out_pad = pl.pallas_call(
      _fused_forward_kernel,
      out_shape=jax.ShapeDtypeStruct((batch, OUT_PAD), jnp.float32),
      in_specs=[vmem] * 10,
      out_specs=vmem,
  )(p1, prep['sel'], prep['w1'], prep['b1'], prep['w2'], prep['b2'],
    prep['fc1w'], prep['fc1b'], prep['fc2w'], prep['fc2b'])
  return out_pad[:, :NUM_CLASSES]


# ------------------------------ params & reference --------------------------- #

def init_params(key):
  ks = jax.random.split(key, 8)
  p = {}
  p['w1'] = 0.1 * jax.random.normal(ks[0], (C1, C_IN, K1), jnp.float32)
  p['b1'] = 0.1 * jax.random.normal(ks[1], (C1,), jnp.float32)
  p['w2'] = 0.1 * jax.random.normal(ks[2], (C2, C1, K2), jnp.float32)
  p['b2'] = 0.1 * jax.random.normal(ks[3], (C2,), jnp.float32)
  p['fc1w'] = 0.1 * jax.random.normal(ks[4], (FC1, C2), jnp.float32)       # (out, in)
  p['fc1b'] = 0.1 * jax.random.normal(ks[5], (FC1,), jnp.float32)
  p['fc2w'] = 0.1 * jax.random.normal(ks[6], (NUM_CLASSES, FC1), jnp.float32)
  p['fc2b'] = 0.1 * jax.random.normal(ks[7], (NUM_CLASSES,), jnp.float32)
  # BatchNorm (eval mode): affine params + running stats, mildly non-trivial.
  a1 = jnp.arange(C1, dtype=jnp.float32)
  p['g1'] = 1.0 + 0.05 * a1 / C1
  p['be1'] = 0.01 * a1
  p['m1'] = 0.02 * jnp.sin(a1)
  p['v1'] = 1.0 + 0.1 * jnp.cos(a1) ** 2
  a2 = jnp.arange(C2, dtype=jnp.float32)
  p['g2'] = 1.0 + 0.03 * a2 / C2
  p['be2'] = -0.01 * a2 / C2
  p['m2'] = 0.01 * jnp.cos(a2)
  p['v2'] = 1.0 + 0.2 * jnp.sin(a2) ** 2
  return p


def reference_forward(x, p):
  xt = jnp.transpose(x, (0, 2, 1))                                # (B, 30, F) NCW

  def conv1d(z, w, b, stride):
    out = jax.lax.conv_general_dilated(
        z, w, window_strides=(stride,), padding='VALID',
        dimension_numbers=('NCH', 'OIH', 'NCH'))
    return out + b[None, :, None]

  def bn(z, g, be, m, v):
    return ((z - m[None, :, None]) / jnp.sqrt(v[None, :, None] + BN_EPS)
            * g[None, :, None] + be[None, :, None])

  h = jax.nn.relu(bn(conv1d(xt, p['w1'], p['b1'], S1),
                     p['g1'], p['be1'], p['m1'], p['v1']))
  h = bn(conv1d(h, p['w2'], p['b2'], S2), p['g2'], p['be2'], p['m2'], p['v2'])
  h = jnp.mean(h, axis=-1)                                        # adaptive pool(1)
  z1 = h @ p['fc1w'].T + p['fc1b']                                # dropout = identity
  z2 = z1 @ p['fc2w'].T + p['fc2b']
  return jax.nn.softmax(z2, axis=1)


# ------------------------------------ main ----------------------------------- #

if __name__ == "__main__":
  key = jax.random.PRNGKey(0)
  kx, kp = jax.random.split(key)

  B, F, D = 2, 64, 30           # (batch, seq_len, features = conv1 in_channels)
  x = jax.random.normal(kx, (B, F, D), jnp.float32)
  params = init_params(kp)

  # Hoisted, one-time parameter preprocessing (BN folding, padding, bf16 cast).
  prep = prepare_params(params, B, F)

  out = jax.block_until_ready(network_forward(x, prep))
  ref = jax.block_until_ready(reference_forward(x, params))

  assert out.shape == (B, NUM_CLASSES)
  # softmax rows sum to 1 (approx reciprocal in the kernel -> loose-ish atol)
  assert np.allclose(np.asarray(out).sum(axis=1), 1.0, atol=5e-3)
  err = np.max(np.abs(np.asarray(out) - np.asarray(ref)))
  # bf16 MXU operands with f32 accumulation -> compare at 2e-2
  assert np.allclose(np.asarray(out), np.asarray(ref), atol=2e-2, rtol=2e-2), err

  print("KERNEL_OK")
</pallas_src>

<mosaic_0001>
module attributes {stable_mosaic.version = 11 : i64} {
  func.func @_fused_forward_kernel(%arg0: memref<40x256xbf16, #tpu.memory_space<vmem>>, %arg1: memref<5x2x40xf32, #tpu.memory_space<vmem>>, %arg2: memref<256x128xbf16, #tpu.memory_space<vmem>>, %arg3: memref<1x128xf32, #tpu.memory_space<vmem>>, %arg4: memref<5x128x128xbf16, #tpu.memory_space<vmem>>, %arg5: memref<1x128xf32, #tpu.memory_space<vmem>>, %arg6: memref<128x128xbf16, #tpu.memory_space<vmem>>, %arg7: memref<1x128xf32, #tpu.memory_space<vmem>>, %arg8: memref<128x128xbf16, #tpu.memory_space<vmem>>, %arg9: memref<1x128xf32, #tpu.memory_space<vmem>>, %arg10: memref<2x128xf32, #tpu.memory_space<vmem>>) attributes {dimension_semantics = [], scalar_prefetch = 0 : i64, scratch_operands = 0 : i64, tpu.core_type = #tpu.core_type<tc>} {
    %c0 = arith.constant 0 : index
    %c0_0 = arith.constant 0 : index
    %0 = vector.load %arg0[%c0, %c0_0] : memref<40x256xbf16, #tpu.memory_space<vmem>>, vector<40x256xbf16>
    %c0_1 = arith.constant 0 : index
    %c0_2 = arith.constant 0 : index
    %1 = vector.load %arg2[%c0_1, %c0_2] : memref<256x128xbf16, #tpu.memory_space<vmem>>, vector<256x128xbf16>
    %cst = arith.constant dense<0.000000e+00> : vector<40x128xf32>
    %2 = tpu.matmul %0, %1, %cst {dimension_numbers = #tpu.dot_dimension_numbers<[1], [0], [0], [1], [0, 0, 1, 1], [], []>} : vector<40x256xbf16>, vector<256x128xbf16>, vector<40x128xf32> -> vector<40x128xf32>
    %c0_3 = arith.constant 0 : index
    %c0_4 = arith.constant 0 : index
    %3 = vector.load %arg3[%c0_3, %c0_4] : memref<1x128xf32, #tpu.memory_space<vmem>>, vector<1x128xf32>
    %4 = vector.broadcast %3 : vector<1x128xf32> to vector<40x128xf32>
    %5 = arith.addf %2, %4 : vector<40x128xf32>
    %cst_5 = arith.constant 0.000000e+00 : f32
    %6 = vector.broadcast %cst_5 : f32 to vector<40x128xf32>
    %7 = arith.maximumf %5, %6 : vector<40x128xf32>
    %cst_6 = arith.constant 0.000000e+00 : f32
    %8 = vector.broadcast %cst_6 : f32 to vector<2x128xf32>
    %c0_7 = arith.constant 0 : index
    %c0_8 = arith.constant 0 : index
    %c0_9 = arith.constant 0 : index
    %9 = vector.load %arg1[%c0_7, %c0_8, %c0_9] : memref<5x2x40xf32, #tpu.memory_space<vmem>>, vector<1x2x40xf32>
    %10 = vector.shape_cast %9 : vector<1x2x40xf32> to vector<2x40xf32>
    %cst_10 = arith.constant dense<0.000000e+00> : vector<2x128xf32>
    %11 = tpu.matmul %10, %7, %cst_10 {dimension_numbers = #tpu.dot_dimension_numbers<[1], [0], [0], [1], [0, 0, 1, 1], [], []>} : vector<2x40xf32>, vector<40x128xf32>, vector<2x128xf32> -> vector<2x128xf32>
    %12 = arith.truncf %11 : vector<2x128xf32> to vector<2x128xbf16>
    %c0_11 = arith.constant 0 : index
    %c0_12 = arith.constant 0 : index
    %c0_13 = arith.constant 0 : index
    %13 = vector.load %arg4[%c0_11, %c0_12, %c0_13] : memref<5x128x128xbf16, #tpu.memory_space<vmem>>, vector<1x128x128xbf16>
    %14 = vector.shape_cast %13 : vector<1x128x128xbf16> to vector<128x128xbf16>
    %cst_14 = arith.constant dense<0.000000e+00> : vector<2x128xf32>
    %15 = tpu.matmul %12, %14, %cst_14 {dimension_numbers = #tpu.dot_dimension_numbers<[1], [0], [0], [1], [0, 0, 1, 1], [], []>} : vector<2x128xbf16>, vector<128x128xbf16>, vector<2x128xf32> -> vector<2x128xf32>
    %16 = arith.addf %8, %15 : vector<2x128xf32>
    %c1 = arith.constant 1 : index
    %c0_15 = arith.constant 0 : index
    %c0_16 = arith.constant 0 : index
    %17 = vector.load %arg1[%c1, %c0_15, %c0_16] : memref<5x2x40xf32, #tpu.memory_space<vmem>>, vector<1x2x40xf32>
    %18 = vector.shape_cast %17 : vector<1x2x40xf32> to vector<2x40xf32>
    %cst_17 = arith.constant dense<0.000000e+00> : vector<2x128xf32>
    %19 = tpu.matmul %18, %7, %cst_17 {dimension_numbers = #tpu.dot_dimension_numbers<[1], [0], [0], [1], [0, 0, 1, 1], [], []>} : vector<2x40xf32>, vector<40x128xf32>, vector<2x128xf32> -> vector<2x128xf32>
    %20 = arith.truncf %19 : vector<2x128xf32> to vector<2x128xbf16>
    %c1_18 = arith.constant 1 : index
    %c0_19 = arith.constant 0 : index
    %c0_20 = arith.constant 0 : index
    %21 = vector.load %arg4[%c1_18, %c0_19, %c0_20] : memref<5x128x128xbf16, #tpu.memory_space<vmem>>, vector<1x128x128xbf16>
    %22 = vector.shape_cast %21 : vector<1x128x128xbf16> to vector<128x128xbf16>
    %cst_21 = arith.constant dense<0.000000e+00> : vector<2x128xf32>
    %23 = tpu.matmul %20, %22, %cst_21 {dimension_numbers = #tpu.dot_dimension_numbers<[1], [0], [0], [1], [0, 0, 1, 1], [], []>} : vector<2x128xbf16>, vector<128x128xbf16>, vector<2x128xf32> -> vector<2x128xf32>
    %24 = arith.addf %16, %23 : vector<2x128xf32>
    %c2 = arith.constant 2 : index
    %c0_22 = arith.constant 0 : index
    %c0_23 = arith.constant 0 : index
    %25 = vector.load %arg1[%c2, %c0_22, %c0_23] : memref<5x2x40xf32, #tpu.memory_space<vmem>>, vector<1x2x40xf32>
    %26 = vector.shape_cast %25 : vector<1x2x40xf32> to vector<2x40xf32>
    %cst_24 = arith.constant dense<0.000000e+00> : vector<2x128xf32>
    %27 = tpu.matmul %26, %7, %cst_24 {dimension_numbers = #tpu.dot_dimension_numbers<[1], [0], [0], [1], [0, 0, 1, 1], [], []>} : vector<2x40xf32>, vector<40x128xf32>, vector<2x128xf32> -> vector<2x128xf32>
    %28 = arith.truncf %27 : vector<2x128xf32> to vector<2x128xbf16>
    %c2_25 = arith.constant 2 : index
    %c0_26 = arith.constant 0 : index
    %c0_27 = arith.constant 0 : index
    %29 = vector.load %arg4[%c2_25, %c0_26, %c0_27] : memref<5x128x128xbf16, #tpu.memory_space<vmem>>, vector<1x128x128xbf16>
    %30 = vector.shape_cast %29 : vector<1x128x128xbf16> to vector<128x128xbf16>
    %cst_28 = arith.constant dense<0.000000e+00> : vector<2x128xf32>
    %31 = tpu.matmul %28, %30, %cst_28 {dimension_numbers = #tpu.dot_dimension_numbers<[1], [0], [0], [1], [0, 0, 1, 1], [], []>} : vector<2x128xbf16>, vector<128x128xbf16>, vector<2x128xf32> -> vector<2x128xf32>
    %32 = arith.addf %24, %31 : vector<2x128xf32>
    %c3 = arith.constant 3 : index
    %c0_29 = arith.constant 0 : index
    %c0_30 = arith.constant 0 : index
    %33 = vector.load %arg1[%c3, %c0_29, %c0_30] : memref<5x2x40xf32, #tpu.memory_space<vmem>>, vector<1x2x40xf32>
    %34 = vector.shape_cast %33 : vector<1x2x40xf32> to vector<2x40xf32>
    %cst_31 = arith.constant dense<0.000000e+00> : vector<2x128xf32>
    %35 = tpu.matmul %34, %7, %cst_31 {dimension_numbers = #tpu.dot_dimension_numbers<[1], [0], [0], [1], [0, 0, 1, 1], [], []>} : vector<2x40xf32>, vector<40x128xf32>, vector<2x128xf32> -> vector<2x128xf32>
    %36 = arith.truncf %35 : vector<2x128xf32> to vector<2x128xbf16>
    %c3_32 = arith.constant 3 : index
    %c0_33 = arith.constant 0 : index
    %c0_34 = arith.constant 0 : index
    %37 = vector.load %arg4[%c3_32, %c0_33, %c0_34] : memref<5x128x128xbf16, #tpu.memory_space<vmem>>, vector<1x128x128xbf16>
    %38 = vector.shape_cast %37 : vector<1x128x128xbf16> to vector<128x128xbf16>
    %cst_35 = arith.constant dense<0.000000e+00> : vector<2x128xf32>
    %39 = tpu.matmul %36, %38, %cst_35 {dimension_numbers = #tpu.dot_dimension_numbers<[1], [0], [0], [1], [0, 0, 1, 1], [], []>} : vector<2x128xbf16>, vector<128x128xbf16>, vector<2x128xf32> -> vector<2x128xf32>
    %40 = arith.addf %32, %39 : vector<2x128xf32>
    %c4 = arith.constant 4 : index
    %c0_36 = arith.constant 0 : index
    %c0_37 = arith.constant 0 : index
    %41 = vector.load %arg1[%c4, %c0_36, %c0_37] : memref<5x2x40xf32, #tpu.memory_space<vmem>>, vector<1x2x40xf32>
    %42 = vector.shape_cast %41 : vector<1x2x40xf32> to vector<2x40xf32>
    %cst_38 = arith.constant dense<0.000000e+00> : vector<2x128xf32>
    %43 = tpu.matmul %42, %7, %cst_38 {dimension_numbers = #tpu.dot_dimension_numbers<[1], [0], [0], [1], [0, 0, 1, 1], [], []>} : vector<2x40xf32>, vector<40x128xf32>, vector<2x128xf32> -> vector<2x128xf32>
    %44 = arith.truncf %43 : vector<2x128xf32> to vector<2x128xbf16>
    %c4_39 = arith.constant 4 : index
    %c0_40 = arith.constant 0 : index
    %c0_41 = arith.constant 0 : index
    %45 = vector.load %arg4[%c4_39, %c0_40, %c0_41] : memref<5x128x128xbf16, #tpu.memory_space<vmem>>, vector<1x128x128xbf16>
    %46 = vector.shape_cast %45 : vector<1x128x128xbf16> to vector<128x128xbf16>
    %cst_42 = arith.constant dense<0.000000e+00> : vector<2x128xf32>
    %47 = tpu.matmul %44, %46, %cst_42 {dimension_numbers = #tpu.dot_dimension_numbers<[1], [0], [0], [1], [0, 0, 1, 1], [], []>} : vector<2x128xbf16>, vector<128x128xbf16>, vector<2x128xf32> -> vector<2x128xf32>
    %48 = arith.addf %40, %47 : vector<2x128xf32>
    %c0_43 = arith.constant 0 : index
    %c0_44 = arith.constant 0 : index
    %49 = vector.load %arg5[%c0_43, %c0_44] : memref<1x128xf32, #tpu.memory_space<vmem>>, vector<1x128xf32>
    %50 = vector.broadcast %49 : vector<1x128xf32> to vector<2x128xf32>
    %51 = arith.addf %48, %50 : vector<2x128xf32>
    %52 = arith.truncf %51 : vector<2x128xf32> to vector<2x128xbf16>
    %c0_45 = arith.constant 0 : index
    %c0_46 = arith.constant 0 : index
    %53 = vector.load %arg6[%c0_45, %c0_46] : memref<128x128xbf16, #tpu.memory_space<vmem>>, vector<128x128xbf16>
    %cst_47 = arith.constant dense<0.000000e+00> : vector<2x128xf32>
    %54 = tpu.matmul %52, %53, %cst_47 {dimension_numbers = #tpu.dot_dimension_numbers<[1], [0], [0], [1], [0, 0, 1, 1], [], []>} : vector<2x128xbf16>, vector<128x128xbf16>, vector<2x128xf32> -> vector<2x128xf32>
    %c0_48 = arith.constant 0 : index
    %c0_49 = arith.constant 0 : index
    %55 = vector.load %arg7[%c0_48, %c0_49] : memref<1x128xf32, #tpu.memory_space<vmem>>, vector<1x128xf32>
    %56 = vector.broadcast %55 : vector<1x128xf32> to vector<2x128xf32>
    %57 = arith.addf %54, %56 : vector<2x128xf32>
    %58 = arith.truncf %57 : vector<2x128xf32> to vector<2x128xbf16>
    %c0_50 = arith.constant 0 : index
    %c0_51 = arith.constant 0 : index
    %59 = vector.load %arg8[%c0_50, %c0_51] : memref<128x128xbf16, #tpu.memory_space<vmem>>, vector<128x128xbf16>
    %cst_52 = arith.constant dense<0.000000e+00> : vector<2x128xf32>
    %60 = tpu.matmul %58, %59, %cst_52 {dimension_numbers = #tpu.dot_dimension_numbers<[1], [0], [0], [1], [0, 0, 1, 1], [], []>} : vector<2x128xbf16>, vector<128x128xbf16>, vector<2x128xf32> -> vector<2x128xf32>
    %c0_53 = arith.constant 0 : index
    %c0_54 = arith.constant 0 : index
    %61 = vector.load %arg9[%c0_53, %c0_54] : memref<1x128xf32, #tpu.memory_space<vmem>>, vector<1x128xf32>
    %62 = vector.broadcast %61 : vector<1x128xf32> to vector<2x128xf32>
    %63 = arith.addf %60, %62 : vector<2x128xf32>
    %cst_55 = arith.constant dense<0xFF800000> : vector<2xf32>
    %64 = vector.multi_reduction <maximumf>, %63, %cst_55 [1] : vector<2x128xf32> to vector<2xf32>
    %65 = vector.shape_cast %64 : vector<2xf32> to vector<2x1xf32>
    %66 = vector.broadcast %65 : vector<2x1xf32> to vector<2x128xf32>
    %67 = arith.subf %63, %66 : vector<2x128xf32>
    %68 = math.exp %67 : vector<2x128xf32>
    %cst_56 = arith.constant dense<0.000000e+00> : vector<2xf32>
    %69 = vector.multi_reduction <add>, %68, %cst_56 [1] : vector<2x128xf32> to vector<2xf32>
    %70 = vector.shape_cast %69 : vector<2xf32> to vector<2x1xf32>
    %71 = tpu.reciprocal %70 {approx = true} : vector<2x1xf32> -> vector<2x1xf32>
    %72 = vector.broadcast %71 : vector<2x1xf32> to vector<2x128xf32>
    %73 = arith.mulf %68, %72 : vector<2x128xf32>
    %c0_57 = arith.constant 0 : index
    %c0_58 = arith.constant 0 : index
    %74 = vector.load %arg10[%c0_57, %c0_58] : memref<2x128xf32, #tpu.memory_space<vmem>>, vector<2x128xf32>
    tpu.vector_store %arg10[%c0_57, %c0_58], %73 {strides = array<i32>} : memref<2x128xf32, #tpu.memory_space<vmem>>, vector<2x128xf32>,
    return
  }
}

</mosaic_0001>

<bundles_post_ra>
// kernel: network_forward.1
= control target key start
LH: loop header
LB: loop body
LE: loop exit
PB: predicated region body
PF: predicated region fallthrough
CT: control target
= control target key end

     0   :  { %s2494_s0 = inlined_call_operand.vmem [shape: bf16[40,256], index: 0, kind: input, shape index: {}]   ;;  %s2495_s1 = inlined_call_operand.vmem [shape: f32[5,2,40], index: 1, kind: input, shape index: {}]   ;;  %s2496_s2 = inlined_call_operand.vmem [shape: bf16[256,128], index: 2, kind: input, shape index: {}]   ;;  %s2497_s3 = inlined_call_operand.vmem [shape: f32[1,128], index: 3, kind: input, shape index: {}]   ;;  %s2498_s4 = inlined_call_operand.vmem [shape: bf16[5,128,128], index: 4, kind: input, shape index: {}]   ;;  %s2499_s5 = inlined_call_operand.vmem [shape: f32[1,128], index: 5, kind: input, shape index: {}]   ;;  %s2500_s6 = inlined_call_operand.vmem [shape: bf16[128,128], index: 6, kind: input, shape index: {}]   ;;  %s2501_s7 = inlined_call_operand.vmem [shape: f32[1,128], index: 7, kind: input, shape index: {}]   ;;  %s2502_s8 = inlined_call_operand.vmem [shape: bf16[128,128], index: 8, kind: input, shape index: {}]   ;;  %s2503_s9 = inlined_call_operand.vmem [shape: f32[1,128], index: 9, kind: input, shape index: {}]   ;;  %s2504_s10 = inlined_call_operand.hbm [shape: f32[2,128], index: 10, kind: output, shape index: {}]  }
   0x1   :  { %v1921_v0 = vld [vmem:[%s2496_s2 + $0x78] sm:$0xff]   ;;  %v1923_v2 = vld [vmem:[%s2496_s2 + $0x70] sm:$0xff]   ;;  %v1925_v4 = vld [vmem:[%s2496_s2 + $0x68] sm:$0xff]  }
   0x2   :  { %v1922_v1 = vld [vmem:[%s2496_s2 + $0x38] sm:$0xff]   ;;  %1586 = vmatprep.subr.bf16.mxu0 %v1921_v0  ;;  %v1924_v3 = vld [vmem:[%s2496_s2 + $0x30] sm:$0xff]   ;;  %v1926_v5 = vld [vmem:[%s2496_s2 + $0x28] sm:$0xff]  }
   0x3   :  { %1587 = vmatpush3.bf16.msra.mxu0 %v1922_v1  ;;  %v1927_v6 = vld [vmem:[%s2496_s2 + $0x60] sm:$0xff]   ;;  %v1929_v8 = vld [vmem:[%s2496_s2 + $0x58] sm:$0xff]   ;;  %v1931_v10 = vld [vmem:[%s2496_s2 + $0x50] sm:$0xff]  }
   0x4   :  { %1588 = vmatprep.subr.bf16.mxu0 %v1923_v2  ;;  %v1928_v7 = vld [vmem:[%s2496_s2 + $0x20] sm:$0xff]   ;;  %v1930_v9 = vld [vmem:[%s2496_s2 + $0x18] sm:$0xff]   ;;  %v1932_v12 = vld [vmem:[%s2496_s2 + $0x10] sm:$0xff]  }
   0x5   :  { %v1939_v11 = vld [vmem:[%s2494_s0 + $0x4] ss:$8 sps:$4 sm:$0xff]   ;;  %v1937_v17 = vld [vmem:[%s2494_s0] ss:$8 sps:$4 sm:$0xff]   ;;  %v1940_v18 = vld [vmem:[%s2494_s0 + $0x14] ss:$8 sps:$4 sm:$0xff]  }
   0x6   :  { %v1933_v13 = vld [vmem:[%s2496_s2 + $0x48] sm:$0xff]   ;;  %236 = vmatprep.mubr.bf16.mxu0 %v1939_v11  ;;  %v1935_v15 = vld [vmem:[%s2496_s2 + $0x40] sm:$0xff]   ;;  %v1942_v20 = vld [vmem:[%s2494_s0 + $0x10] ss:$8 sps:$4 sm:$0xff]  }
   0x7   :  { %1589 = vmatpush3.bf16.msra.mxu0 %v1924_v3  ;;  %v1934_v14 = vld [vmem:[%s2496_s2 + $0x8] sm:$0xff]   ;;  %v1936_v16 = vld [vmem:[%s2496_s2] sm:$0xff]  }
   0x8   :  { %1590 = vmatprep.subr.bf16.mxu0 %v1925_v4  ;;  %v41_v19 = vld [vmem:[%s2494_s0 + $0x20] sm:$0xff] }
   0x9   :  { %v1437_v21 = vcombine.high %v41_v19, %v41_v19  ;;  %v1436_v22 = vcombine.low %v41_v19, %v41_v19 }
   0xb   :  { %1591 = vmatpush3.bf16.msra.mxu0 %v1926_v5 }
   0xc   :  { %1592 = vmatprep.subr.bf16.mxu0 %v1927_v6 }
   0xf   :  { %1593 = vmatpush3.bf16.msra.mxu0 %v1928_v7 }
  0x10   :  { %1594 = vmatprep.subr.bf16.mxu0 %v1929_v8 }
  0x13   :  { %1595 = vmatpush3.bf16.msra.mxu0 %v1930_v9 }
  0x14   :  { %1596 = vmatprep.subr.bf16.mxu0 %v1931_v10 }
  0x17   :  { %1597 = vmatpush3.bf16.msra.mxu0 %v1932_v12 }
  0x18   :  { %1598 = vmatprep.subr.bf16.mxu0 %v1933_v13 }
  0x1b   :  { %1599 = vmatpush3.bf16.msra.mxu0 %v1934_v14 }
  0x1c   :  { %1600 = vmatprep.subr.bf16.mxu0 %v1935_v15 }
  0x1f   :  { %1601 = vmatpush3.bf16.msra.mxu0 %v1936_v16 }
  0x22   :  { %237 = vmatmul.mubr.bf16.vlgmr.msra.gmra.mxu0 %v1937_v17 }
  0x23   :  { %244 = vmatprep.mubr.bf16.mxu0 %v1940_v18 }
  0x2a   :  { %245 = vmatmul.mubr.bf16.gmra.mxu0 %v1942_v20 }
  0x2b   :  { %252 = vmatprep.mubr.bf16.mxu0 %v1437_v21 }
  0x32   :  { %253 = vmatmul.mubr.bf16.gmra.mxu0 %v1436_v22 }
  0x33   :  { %15 = vsyncpa [#allocation3], 0  ;;  %v2027_v23 = vmov 0.0   ;;  %vm2028_vm0 = vmmov 0   ;;  %v1945_v24 = vld [vmem:[%s2498_s4 + $0x38] sm:$0xff]   ;;  %v1946_v25 = vld [vmem:[%s2498_s4 + $0x30] sm:$0xff]  }
  0x34   :  { %1713 = vmatprep.subr.mxu1 %v2027_v23  ;;  %1759 = vmatprep.subr.bf16.mxu0 %v2027_v23  ;;  %v1947_v26 = vld [vmem:[%s2498_s4 + $0x28] sm:$0xff]   ;;  %v1949_v27 = vld [vmem:[%s2498_s4 + $0x20] sm:$0xff]   ;;  %v1951_v28 = vld [vmem:[%s2498_s4 + $0x18] sm:$0xff]   ;;  %vm266_vm1 = vcmask 326656   ;;  %vm1404_vm2 = vcmask 1041408  }
  0x35   :  { %1723 = vmatprep.mubr.msk.f32.mxu1 %vm2028_vm0, %v2027_v23  ;;  %1775 = vmatprep.mubr.msk.bf16.mxu0 %vm2028_vm0, %v2027_v23  ;;  %v1953_v29 = vld [vmem:[%s2498_s4 + $0x10] sm:$0xff]   ;;  %v1955_v30 = vld [vmem:[%s2498_s4 + $0x8] sm:$0xff]   ;;  %v1957_v31 = vld [vmem:[%s2498_s4] sm:$0xff]  }
  0x36   :  { %1760 = vmatpush3.bf16.msra.mxu0 %v1945_v24  ;;  %v1431_v45 = vld [vmem:[%s2497_s3] ss:$0 sm:$0xff]  ;;  %v1455_v61 = vld [vmem:[%s2495_s1 + $0x2] sm:$0x3]  ;;  %v1948_v62 = vld [vmem:[%s2498_s4 + $0x78] sm:$0xff]  }
  0x37   :  { %1761 = vmatprep.subr.bf16.mxu0 %v2027_v23  ;;  %v265_v60 = vld [vmem:[%s2495_s1] sm:$0x3]  ;;  %v1950_v63 = vld [vmem:[%s2498_s4 + $0x70] sm:$0xff]   ;;  %v1952_v0 = vld [vmem:[%s2498_s4 + $0x68] sm:$0xff]  }
  0x38   :  { %v1954_v1 = vld [vmem:[%s2498_s4 + $0x60] sm:$0xff]   ;;  %v1956_v2 = vld [vmem:[%s2498_s4 + $0x58] sm:$0xff]   ;;  %v1958_v3 = vld [vmem:[%s2498_s4 + $0x50] sm:$0xff]  }
  0x39   :  { %v1959_v4 = vld [vmem:[%s2498_s4 + $0x48] sm:$0xff]   ;;  %v1960_v5 = vld [vmem:[%s2498_s4 + $0x40] sm:$0xff]   ;;  %v1961_v13 = vld [vmem:[%s2498_s4 + $0xb8] sm:$0xff]  }
  0x3a   :  { %1762 = vmatpush3.bf16.msra.mxu0 %v1946_v25  ;;  %v1489_v10 = vld [vmem:[%s2495_s1 + $0x4] sm:$0x3]  ;;  %v1962_v14 = vld [vmem:[%s2498_s4 + $0xb0] sm:$0xff]   ;;  %v1515_v15 = vld [vmem:[%s2495_s1 + $0x6] sm:$0x3] }
  0x3b   :  { %1763 = vmatprep.subr.bf16.mxu0 %v2027_v23  ;;  %v1963_v16 = vld [vmem:[%s2498_s4 + $0xa8] sm:$0xff]   ;;  %v1964_v17 = vld [vmem:[%s2498_s4 + $0xf8] sm:$0xff]   ;;  %v1965_v18 = vld [vmem:[%s2498_s4 + $0xa0] sm:$0xff]  }
  0x3c   :  { %v1966_v19 = vld [vmem:[%s2498_s4 + $0xf0] sm:$0xff]   ;;  %v1967_v20 = vld [vmem:[%s2498_s4 + $0x98] sm:$0xff]   ;;  %v1968_v21 = vld [vmem:[%s2498_s4 + $0xe8] sm:$0xff]  }
  0x3d   :  { %v1969_v22 = vld [vmem:[%s2498_s4 + $0x90] sm:$0xff]   ;;  %v1970_v24 = vld [vmem:[%s2498_s4 + $0xe0] sm:$0xff]   ;;  %v1971_v25 = vld [vmem:[%s2498_s4 + $0x88] sm:$0xff]  }
  0x3e   :  { %1764 = vmatpush3.bf16.msra.mxu0 %v1947_v26  ;;  %v1972_v26 = vld [vmem:[%s2498_s4 + $0xd8] sm:$0xff]  }
  0x3f   :  { %1765 = vmatprep.subr.bf16.mxu0 %v2027_v23 }
  0x42   :  { %1766 = vmatpush3.bf16.msra.mxu0 %v1949_v27  ;;  %v1973_v27 = vld [vmem:[%s2498_s4 + $0x80] sm:$0xff]  }
  0x43   :  { %1767 = vmatprep.subr.bf16.mxu0 %v2027_v23 }
  0x46   :  { %1768 = vmatpush3.bf16.msra.mxu0 %v1951_v28  ;;  %v1974_v28 = vld [vmem:[%s2498_s4 + $0xd0] sm:$0xff]  }
  0x47   :  { %1769 = vmatprep.subr.bf16.mxu0 %v2027_v23 }
  0x4a   :  { %1770 = vmatpush3.bf16.msra.mxu0 %v1953_v29  ;;  %v1975_v29 = vld [vmem:[%s2498_s4 + $0xc8] sm:$0xff]  }
  0x4b   :  { %1771 = vmatprep.subr.bf16.mxu0 %v2027_v23 }
  0x4e   :  { %1772 = vmatpush3.bf16.msra.mxu0 %v1955_v30  ;;  %v1976_v30 = vld [vmem:[%s2498_s4 + $0xc0] sm:$0xff]  }
  0x4f   :  { %1773 = vmatprep.subr.bf16.mxu0 %v2027_v23 }
  0x52   :  { %1774 = vmatpush3.bf16.msra.mxu0 %v1957_v31 }
  0x53   :  { %1779 = vmatprep.subr.mxu0 %v2027_v23 }
  0xe2   :  { %v1602_v32 = vpop.f32.mrf.mxu0 }
  0xe4   :  { %v1603_v33 = vpop.f32.mrf.mxu0 }
  0xe5   :  { %v1604_v51 = vadd.f32 %v1603_v33, %v1602_v32 }
  0xe6   :  { %v1605_v34 = vpop.f32.mrf.mxu0 }
  0xe7   :  { %v239_v56 = vadd.f32 %v1604_v51, %v1431_v45  ;;  %v1981_v51 = vld [vmem:[%s2498_s4 + $0x118] sm:$0xff]  }
  0xe8   :  { %v1606_v35 = vpop.f32.mrf.mxu0 }
  0xe9   :  { %v1607_v47 = vadd.f32 %v1606_v35, %v1605_v34  ;;  %v2203_v59 = vmax.f32 %v239_v56, 0.0  ;;  %v1986_v56 = vld [vmem:[%s2500_s6 + $0x30] sm:$0xff]  }
  0xea   :  { %v1608_v36 = vpop.f32.mrf.mxu0 }
  0xeb   :  { %v242_v54 = vadd.f32 %v1607_v47, %v1431_v45 }
  0xec   :  { %v1609_v37 = vpop.f32.mrf.mxu0 }
  0xed   :  { %v1610_v43 = vadd.f32 %v1609_v37, %v1608_v36  ;;  %v2199_v58 = vmax.f32 %v242_v54, 0.0  ;;  %v1984_v54 = vld [vmem:[%s2498_s4 + $0x100] sm:$0xff]  }
  0xee   :  { %v1611_v38 = vpop.f32.mrf.mxu0 }
  0xef   :  { %v247_v52 = vadd.f32 %v1610_v43, %v1431_v45 }
  0xf0   :  { %v1612_v39 = vpop.f32.mrf.mxu0 }
  0xf1   :  { %v1613_v41 = vadd.f32 %v1612_v39, %v1611_v38  ;;  %v2195_v57 = vmax.f32 %v247_v52, 0.0  ;;  %v1982_v52 = vld [vmem:[%s2498_s4 + $0x110] sm:$0xff]  }
  0xf2   :  { %v1614_v40 = vpop.f32.mrf.mxu0 }
  0xf3   :  { %v250_v48 = vadd.f32 %v1613_v41, %v1431_v45 }
  0xf4   :  { %v1615_v42 = vpop.f32.mrf.mxu0 }
  0xf5   :  { %v1616_v44 = vadd.f32 %v1615_v42, %v1614_v40  ;;  %v2191_v55 = vmax.f32 %v250_v48, 0.0  ;;  %v1978_v48 = vld [vmem:[%s2498_s4 + $0x130] sm:$0xff]  }
  0xf6   :  { %v1617_v46 = vpop.f32.mrf.mxu0 }
  0xf7   :  { %v255_v49 = vadd.f32 %v1616_v44, %v1431_v45  ;;  %v1541_v44 = vld [vmem:[%s2495_s1 + $0x8] sm:$0x3]  ;;  %v1977_v46 = vld [vmem:[%s2498_s4 + $0x138] sm:$0xff]  }
  0xf8   :  { %v1618_v50 = vpop.f32.mrf.mxu0 }
  0xf9   :  { %v2189_v53 = vmax.f32 %v255_v49, 0.0  ;;  %v1979_v49 = vld [vmem:[%s2498_s4 + $0x128] sm:$0xff]   ;;  %v1980_v50 = vld [vmem:[%s2498_s4 + $0x120] sm:$0xff]  }
  0xfb   :  { %1714 = vmatpush3.msra.mxu1 %v2189_v53 }
  0xfc   :  { %1715 = vmatprep.subr.mxu1 %v2027_v23 }
  0xfd   :  { %1716 = vmatpush3.msra.mxu1 %v2191_v55 }
  0xfe   :  { %1717 = vmatprep.subr.mxu1 %v2027_v23 }
  0xff   :  { %1718 = vmatpush3.msra.mxu1 %v2195_v57 }
 0x100   :  { %1719 = vmatprep.subr.mxu1 %v2027_v23 }
 0x101   :  { %1720 = vmatpush3.msra.mxu1 %v2199_v58 }
 0x102   :  { %1721 = vmatprep.subr.mxu1 %v2027_v23 }
 0x103   :  { %1722 = vmatpush3.msra.mxu1 %v2203_v59 }
 0x104   :  { %1724 = vmatmul.mubr.msk.f32.vlgmr.msra.gmra.mxu1 %vm266_vm1, %v265_v60  ;;  %1726 = vmatprep.subr.mxu1 %v2027_v23  ;;  %v1990_v60 = vld [vmem:[%s2500_s6 + $0x10] sm:$0xff]  }
 0x105   :  { %1727 = vmatpush3.msra.mxu1 %v2189_v53  ;;  %1736 = vmatprep.mubr.msk.f32.mxu1 %vm2028_vm0, %v2027_v23 }
 0x106   :  { %1728 = vmatprep.subr.mxu1 %v2027_v23 }
 0x107   :  { %1729 = vmatpush3.msra.mxu1 %v2191_v55 }
 0x108   :  { %1730 = vmatprep.subr.mxu1 %v2027_v23 }
 0x109   :  { %1731 = vmatpush3.msra.mxu1 %v2195_v57 }
 0x10a   :  { %1732 = vmatprep.subr.mxu1 %v2027_v23 }
 0x10b   :  { %1733 = vmatpush3.msra.mxu1 %v2199_v58 }
 0x10c   :  { %1734 = vmatprep.subr.mxu1 %v2027_v23 }
 0x10d   :  { %1735 = vmatpush3.msra.mxu1 %v2203_v59 }
 0x10e   :  { %1737 = vmatmul.mubr.msk.f32.vlgmr.msra.gmra.mxu1 %vm266_vm1, %v1455_v61  ;;  %1739 = vmatprep.subr.bf16.mxu1 %v2027_v23 }
 0x10f   :  { %1740 = vmatpush3.bf16.msra.mxu1 %v1948_v62  ;;  %1755 = vmatprep.mubr.msk.bf16.mxu1 %vm2028_vm0, %v2027_v23 }
 0x110   :  { %1741 = vmatprep.subr.bf16.mxu1 %v2027_v23 }
 0x113   :  { %1742 = vmatpush3.bf16.msra.mxu1 %v1950_v63 }
 0x114   :  { %1743 = vmatprep.subr.bf16.mxu1 %v2027_v23 }
 0x117   :  { %1744 = vmatpush3.bf16.msra.mxu1 %v1952_v0 }
 0x118   :  { %1745 = vmatprep.subr.bf16.mxu1 %v2027_v23 }
 0x11b   :  { %1746 = vmatpush3.bf16.msra.mxu1 %v1954_v1 }
 0x11c   :  { %1747 = vmatprep.subr.bf16.mxu1 %v2027_v23 }
 0x11f   :  { %1748 = vmatpush3.bf16.msra.mxu1 %v1956_v2 }
 0x120   :  { %1749 = vmatprep.subr.bf16.mxu1 %v2027_v23 }
 0x123   :  { %1750 = vmatpush3.bf16.msra.mxu1 %v1958_v3 }
 0x124   :  { %1751 = vmatprep.subr.bf16.mxu1 %v2027_v23 }
 0x127   :  { %1752 = vmatpush3.bf16.msra.mxu1 %v1959_v4 }
 0x128   :  { %1753 = vmatprep.subr.bf16.mxu1 %v2027_v23 }
 0x12b   :  { %1754 = vmatpush3.bf16.msra.mxu1 %v1960_v5 }
 0x12c   :  { %1792 = vmatprep.subr.bf16.mxu1 %v2027_v23 }
 0x1c4   :  { %v336_v6 = vpop.f32.mrf.mxu1 }
 0x1c5   :  { %v340_v7 = vpack.c.bf16 %v336_v6, %v336_v6 }
 0x1c6   :  { %v1725_v8 = vpop.f32.mrf.mxu1 }
 0x1c7   :  { %1776 = vmatmul.mubr.bf16.vlgmr.msra.gmra.mxu0 %v340_v7 }
 0x1c8   :  { %1780 = vmatpush3.msra.mxu0 %v2189_v53  ;;  %1789 = vmatprep.mubr.msk.f32.mxu0 %vm2028_vm0, %v2027_v23 }
 0x1c9   :  { %1781 = vmatprep.subr.mxu0 %v2027_v23 }
 0x1ca   :  { %1782 = vmatpush3.msra.mxu0 %v2191_v55 }
 0x1cb   :  { %1783 = vmatprep.subr.mxu0 %v2027_v23 }
 0x1cc   :  { %1784 = vmatpush3.msra.mxu0 %v2195_v57 }
 0x1cd   :  { %1785 = vmatprep.subr.mxu0 %v2027_v23 }
 0x1ce   :  { %1786 = vmatpush3.msra.mxu0 %v2199_v58  ;;  %v428_v9 = vpop.f32.mrf.mxu1 }
 0x1cf   :  { %v432_v11 = vpack.c.bf16 %v428_v9, %v428_v9  ;;  %1787 = vmatprep.subr.mxu0 %v2027_v23 }
 0x1d0   :  { %1788 = vmatpush3.msra.mxu0 %v2203_v59  ;;  %v1738_v12 = vpop.f32.mrf.mxu1 }
 0x1d1   :  { %1790 = vmatmul.mubr.msk.f32.vlgmr.msra.gmra.mxu0 %vm266_vm1, %v1489_v10  ;;  %1812 = vmatprep.subr.mxu0 %v2027_v23  ;;  %v1991_v10 = vld [vmem:[%s2500_s6 + $0x8] sm:$0xff]   ;;  %v1993_v12 = vld [vmem:[%s2502_s8 + $0x38] sm:$0xff]  }
 0x1d2   :  { %1756 = vmatmul.mubr.bf16.vlgmr.msra.gmra.mxu1 %v432_v11  ;;  %1813 = vmatpush3.msra.mxu0 %v2189_v53  ;;  %v1992_v11 = vld [vmem:[%s2500_s6] sm:$0xff]  }
 0x1d3   :  { %1814 = vmatprep.subr.mxu0 %v2027_v23  ;;  %1822 = vmatprep.mubr.msk.f32.mxu0 %vm2028_vm0, %v2027_v23 }
 0x1d4   :  { %1815 = vmatpush3.msra.mxu0 %v2191_v55  ;;  %1793 = vmatpush3.bf16.msra.mxu1 %v1961_v13  ;;  %v1994_v13 = vld [vmem:[%s2502_s8 + $0x30] sm:$0xff]  }
 0x1d5   :  { %1816 = vmatprep.subr.mxu0 %v2027_v23  ;;  %1794 = vmatprep.subr.bf16.mxu1 %v2027_v23 }
 0x1d6   :  { %1817 = vmatpush3.msra.mxu0 %v2195_v57  ;;  %1808 = vmatprep.mubr.msk.bf16.mxu1 %vm2028_vm0, %v2027_v23 }
 0x1d7   :  { %1818 = vmatprep.subr.mxu0 %v2027_v23 }
 0x1d8   :  { %1819 = vmatpush3.msra.mxu0 %v2199_v58  ;;  %1795 = vmatpush3.bf16.msra.mxu1 %v1962_v14  ;;  %v1995_v14 = vld [vmem:[%s2502_s8 + $0x28] sm:$0xff]  }
 0x1d9   :  { %1820 = vmatprep.subr.mxu0 %v2027_v23  ;;  %1796 = vmatprep.subr.bf16.mxu1 %v2027_v23 }
 0x1da   :  { %1821 = vmatpush3.msra.mxu0 %v2203_v59 }
 0x1db   :  { %1823 = vmatmul.mubr.msk.f32.vlgmr.msra.gmra.mxu0 %vm266_vm1, %v1515_v15  ;;  %1825 = vmatprep.subr.bf16.mxu0 %v2027_v23  ;;  %v1996_v15 = vld [vmem:[%s2502_s8 + $0x20] sm:$0xff]  }
 0x1dc   :  { %1797 = vmatpush3.bf16.msra.mxu1 %v1963_v16  ;;  %1826 = vmatpush3.bf16.msra.mxu0 %v1964_v17  ;;  %v1997_v16 = vld [vmem:[%s2502_s8 + $0x18] sm:$0xff]   ;;  %v1998_v17 = vld [vmem:[%s2502_s8 + $0x10] sm:$0xff]  }
 0x1dd   :  { %1798 = vmatprep.subr.bf16.mxu1 %v2027_v23  ;;  %1827 = vmatprep.subr.bf16.mxu0 %v2027_v23 }
 0x1de   :  { %1841 = vmatprep.mubr.msk.bf16.mxu0 %vm2028_vm0, %v2027_v23 }
 0x1e0   :  { %1799 = vmatpush3.bf16.msra.mxu1 %v1965_v18  ;;  %1828 = vmatpush3.bf16.msra.mxu0 %v1966_v19  ;;  %v1999_v18 = vld [vmem:[%s2502_s8 + $0x8] sm:$0xff]  }
 0x1e1   :  { %1800 = vmatprep.subr.bf16.mxu1 %v2027_v23  ;;  %1829 = vmatprep.subr.bf16.mxu0 %v2027_v23 }
 0x1e4   :  { %1801 = vmatpush3.bf16.msra.mxu1 %v1967_v20  ;;  %1830 = vmatpush3.bf16.msra.mxu0 %v1968_v21  ;;  %v1567_v20 = vld [vmem:[%s2499_s5] ss:$0 sm:$0xff] }
 0x1e5   :  { %1802 = vmatprep.subr.bf16.mxu1 %v2027_v23  ;;  %1831 = vmatprep.subr.bf16.mxu0 %v2027_v23 }
 0x1e8   :  { %1803 = vmatpush3.bf16.msra.mxu1 %v1969_v22  ;;  %1832 = vmatpush3.bf16.msra.mxu0 %v1970_v24 }
 0x1e9   :  { %1804 = vmatprep.subr.bf16.mxu1 %v2027_v23  ;;  %1833 = vmatprep.subr.bf16.mxu0 %v2027_v23 }
 0x1ec   :  { %1805 = vmatpush3.bf16.msra.mxu1 %v1971_v25  ;;  %1834 = vmatpush3.bf16.msra.mxu0 %v1972_v26 }
 0x1ed   :  { %1806 = vmatprep.subr.bf16.mxu1 %v2027_v23  ;;  %1835 = vmatprep.subr.bf16.mxu0 %v2027_v23 }
 0x1f0   :  { %1807 = vmatpush3.bf16.msra.mxu1 %v1973_v27  ;;  %1836 = vmatpush3.bf16.msra.mxu0 %v1974_v28  ;;  %v2000_v28 = vld [vmem:[%s2502_s8] sm:$0xff]  }
 0x1f1   :  { %1845 = vmatprep.subr.mxu1 %v2027_v23  ;;  %1837 = vmatprep.subr.bf16.mxu0 %v2027_v23 }
 0x1f4   :  { %1838 = vmatpush3.bf16.msra.mxu0 %v1975_v29 }
 0x1f5   :  { %1839 = vmatprep.subr.bf16.mxu0 %v2027_v23 }
 0x1f8   :  { %1840 = vmatpush3.bf16.msra.mxu0 %v1976_v30 }
 0x1f9   :  { %1878 = vmatprep.subr.bf16.mxu0 %v2027_v23 }
 0x287   :  { %v620_v31 = vpop.f32.mrf.mxu0 }
 0x289   :  { %v1777_v32 = vpop.f32.mrf.mxu0 }
 0x28b   :  { %v623_v33 = vpop.f32.mrf.mxu0 }
 0x28d   :  { %v1778_v34 = vpop.f32.mrf.mxu0 }
 0x291   :  { %v697_v35 = vpop.f32.mrf.mxu0 }
 0x292   :  { %v701_v36 = vpack.c.bf16 %v697_v35, %v697_v35  ;;  %v532_v37 = vpop.f32.mrf.mxu1  ;;  %v1577_v35 = vld [vmem:[%s2503_s9] ss:$0 sm:$0xff] }
 0x293   :  { %v2363_v38 = vadd.f32 %v620_v31, %v532_v37  ;;  %v1791_v39 = vpop.f32.mrf.mxu0 }
 0x294   :  { %1809 = vmatmul.mubr.bf16.vlgmr.msra.gmra.mxu1 %v701_v36  ;;  %v1757_v40 = vpop.f32.mrf.mxu1 }
 0x295   :  { %1846 = vmatpush3.msra.mxu1 %v2189_v53  ;;  %1855 = vmatprep.mubr.msk.f32.mxu1 %vm2028_vm0, %v2027_v23  ;;  %v1983_v53 = vld [vmem:[%s2498_s4 + $0x108] sm:$0xff]  }
 0x296   :  { %1847 = vmatprep.subr.mxu1 %v2027_v23  ;;  %v535_v41 = vpop.f32.mrf.mxu1 }
 0x297   :  { %1848 = vmatpush3.msra.mxu1 %v2191_v55  ;;  %v1985_v55 = vld [vmem:[%s2500_s6 + $0x38] sm:$0xff]  }
 0x298   :  { %1849 = vmatprep.subr.mxu1 %v2027_v23  ;;  %v1758_v42 = vpop.f32.mrf.mxu1 }
 0x299   :  { %1850 = vmatpush3.msra.mxu1 %v2195_v57  ;;  %v1987_v57 = vld [vmem:[%s2500_s6 + $0x28] sm:$0xff]  }
 0x29a   :  { %1851 = vmatprep.subr.mxu1 %v2027_v23 }
 0x29b   :  { %1852 = vmatpush3.msra.mxu1 %v2199_v58  ;;  %v879_v43 = vpop.f32.mrf.mxu0  ;;  %v1988_v58 = vld [vmem:[%s2500_s6 + $0x20] sm:$0xff]  }
 0x29c   :  { %v883_v45 = vpack.c.bf16 %v879_v43, %v879_v43  ;;  %1853 = vmatprep.subr.mxu1 %v2027_v23 }
 0x29d   :  { %1854 = vmatpush3.msra.mxu1 %v2203_v59  ;;  %v1824_v47 = vpop.f32.mrf.mxu0  ;;  %v1989_v59 = vld [vmem:[%s2500_s6 + $0x18] sm:$0xff]  }
 0x29e   :  { %1856 = vmatmul.mubr.msk.f32.vlgmr.msra.gmra.mxu1 %vm266_vm1, %v1541_v44  ;;  %1842 = vmatmul.mubr.bf16.vlgmr.msra.gmra.mxu0 %v883_v45 }
 0x29f   :  { %1858 = vmatprep.subr.bf16.mxu1 %v2027_v23  ;;  %1874 = vmatprep.mubr.msk.bf16.mxu1 %vm2028_vm0, %v2027_v23 }
 0x2a0   :  { %1859 = vmatpush3.bf16.msra.mxu1 %v1977_v46  ;;  %1894 = vmatprep.mubr.msk.bf16.mxu0 %vm2028_vm0, %v2027_v23 }
 0x2a1   :  { %1860 = vmatprep.subr.bf16.mxu1 %v2027_v23  ;;  %1879 = vmatpush3.bf16.msra.mxu0 %v1985_v55 }
 0x2a2   :  { %1880 = vmatprep.subr.bf16.mxu0 %v2027_v23 }
 0x2a4   :  { %1861 = vmatpush3.bf16.msra.mxu1 %v1978_v48 }
 0x2a5   :  { %1862 = vmatprep.subr.bf16.mxu1 %v2027_v23  ;;  %1881 = vmatpush3.bf16.msra.mxu0 %v1986_v56 }
 0x2a6   :  { %1882 = vmatprep.subr.bf16.mxu0 %v2027_v23 }
 0x2a8   :  { %1863 = vmatpush3.bf16.msra.mxu1 %v1979_v49 }
 0x2a9   :  { %1864 = vmatprep.subr.bf16.mxu1 %v2027_v23  ;;  %1883 = vmatpush3.bf16.msra.mxu0 %v1987_v57 }
 0x2aa   :  { %1884 = vmatprep.subr.bf16.mxu0 %v2027_v23 }
 0x2ac   :  { %1865 = vmatpush3.bf16.msra.mxu1 %v1980_v50 }
 0x2ad   :  { %1866 = vmatprep.subr.bf16.mxu1 %v2027_v23  ;;  %1885 = vmatpush3.bf16.msra.mxu0 %v1988_v58 }
 0x2ae   :  { %1886 = vmatprep.subr.bf16.mxu0 %v2027_v23 }
 0x2b0   :  { %1867 = vmatpush3.bf16.msra.mxu1 %v1981_v51 }
 0x2b1   :  { %1868 = vmatprep.subr.bf16.mxu1 %v2027_v23  ;;  %1887 = vmatpush3.bf16.msra.mxu0 %v1989_v59 }
 0x2b2   :  { %1888 = vmatprep.subr.bf16.mxu0 %v2027_v23 }
 0x2b4   :  { %1869 = vmatpush3.bf16.msra.mxu1 %v1982_v52 }
 0x2b5   :  { %1870 = vmatprep.subr.bf16.mxu1 %v2027_v23  ;;  %1889 = vmatpush3.bf16.msra.mxu0 %v1990_v60 }
 0x2b6   :  { %1890 = vmatprep.subr.bf16.mxu0 %v2027_v23 }
 0x2b8   :  { %1871 = vmatpush3.bf16.msra.mxu1 %v1983_v53 }
 0x2b9   :  { %1872 = vmatprep.subr.bf16.mxu1 %v2027_v23  ;;  %1891 = vmatpush3.bf16.msra.mxu0 %v1991_v10 }
 0x2ba   :  { %1892 = vmatprep.subr.bf16.mxu0 %v2027_v23 }
 0x2bc   :  { %1873 = vmatpush3.bf16.msra.mxu1 %v1984_v54 }
 0x2bd   :  { %1898 = vmatprep.subr.bf16.mxu1 %v2027_v23  ;;  %1893 = vmatpush3.bf16.msra.mxu0 %v1992_v11 }
 0x354   :  { %v801_v61 = vpop.f32.mrf.mxu1 }
 0x355   :  { %v807_v62 = vadd.f32 %v801_v61, %v2363_v38 }
 0x356   :  { %v1810_v63 = vpop.f32.mrf.mxu1 }
 0x358   :  { %v804_v0 = vpop.f32.mrf.mxu1 }
 0x35a   :  { %v1811_v1 = vpop.f32.mrf.mxu1 }
 0x35e   :  { %v1061_v2 = vpop.f32.mrf.mxu1  ;;  %v983_v3 = vpop.f32.mrf.mxu0 }
 0x35f   :  { %v1065_v4 = vpack.c.bf16 %v1061_v2, %v1061_v2  ;;  %v989_v5 = vadd.f32 %v983_v3, %v807_v62 }
 0x360   :  { %v1857_v6 = vpop.f32.mrf.mxu1  ;;  %v1843_v7 = vpop.f32.mrf.mxu0 }
 0x361   :  { %1875 = vmatmul.mubr.bf16.vlgmr.msra.gmra.mxu1 %v1065_v4 }
 0x362   :  { %v986_v8 = vpop.f32.mrf.mxu0  ;;  %1914 = vmatprep.mubr.msk.bf16.mxu1 %vm2028_vm0, %v2027_v23  ;;  %1899 = vmatpush3.bf16.msra.mxu1 %v1993_v12 }
 0x363   :  { %1900 = vmatprep.subr.bf16.mxu1 %v2027_v23 }
 0x364   :  { %v1844_v9 = vpop.f32.mrf.mxu0 }
 0x366   :  { %1901 = vmatpush3.bf16.msra.mxu1 %v1994_v13 }
 0x367   :  { %1902 = vmatprep.subr.bf16.mxu1 %v2027_v23 }
 0x36a   :  { %1903 = vmatpush3.bf16.msra.mxu1 %v1995_v14 }
 0x36b   :  { %1904 = vmatprep.subr.bf16.mxu1 %v2027_v23 }
 0x36e   :  { %1905 = vmatpush3.bf16.msra.mxu1 %v1996_v15 }
 0x36f   :  { %1906 = vmatprep.subr.bf16.mxu1 %v2027_v23 }
 0x372   :  { %1907 = vmatpush3.bf16.msra.mxu1 %v1997_v16 }
 0x373   :  { %1908 = vmatprep.subr.bf16.mxu1 %v2027_v23 }
 0x376   :  { %1909 = vmatpush3.bf16.msra.mxu1 %v1998_v17 }
 0x377   :  { %1910 = vmatprep.subr.bf16.mxu1 %v2027_v23 }
 0x37a   :  { %1911 = vmatpush3.bf16.msra.mxu1 %v1999_v18 }
 0x37b   :  { %1912 = vmatprep.subr.bf16.mxu1 %v2027_v23  ;;  %v1568_v23 = vld [vmem:[%s2501_s7] ss:$0 sm:$0xff]  ;;  %s2029_s7 = smov [#allocation2]  }
 0x37c   :  { %s1423_s8 = sshll.u32 %s2029_s7, 4  ;;  %s1424_s8 = int_to_ptr.vmem [resolvable:$true] %s1423_s8 }
 0x37d   :  { %s2005_s9 = scalar_lea.vmem %s1424_s8, 32  ;;  %p2010_p1 = scmp.lt.s32.totalorder %s1424_s8, %s1424_s8 }
 0x37e   :  { %1913 = vmatpush3.bf16.msra.mxu1 %v2000_v28  ;;  %p2006_p0 = scmp.ne.s32.totalorder %s1424_s8, %s2005_s9  ;;  %p2011_p2 = scmp.lt.s32.totalorder %s2005_s9, %s2005_s9 }
 0x380   :  { %p2012_p3 = por %p2011_p2, %p2010_p1 }
 0x382   :  { %p2013_p4 = pnand %p2012_p3, %p2006_p0 }
 0x421   :  { %v1165_v19 = vpop.f32.mrf.mxu1 }
 0x422   :  { %v1171_v21 = vadd.f32 %v1165_v19, %v989_v5 }
 0x423   :  { %v1876_v22 = vpop.f32.mrf.mxu1 }
 0x424   :  { %v1179_v24 = vadd.f32 %v1567_v20, %v1171_v21 }
 0x425   :  { %v1168_v25 = vpop.f32.mrf.mxu1 }
 0x426   :  { %v1180_v26 = vpack.c.bf16 %v1179_v24, %v1179_v24 }
 0x427   :  { %v1877_v27 = vpop.f32.mrf.mxu1 }
 0x428   :  { %1895 = vmatmul.mubr.bf16.vlgmr.msra.gmra.mxu0 %v1180_v26 }
 0x4e8   :  { %v1286_v29 = vpop.f32.mrf.mxu0 }
 0x4e9   :  { %v1287_v30 = vadd.f32 %v1568_v23, %v1286_v29 }
 0x4ea   :  { %v1896_v31 = vpop.f32.mrf.mxu0 }
 0x4eb   :  { %v1292_v32 = vpack.c.bf16 %v1287_v30, %v1287_v30 }
 0x4ec   :  { %v1289_v33 = vpop.f32.mrf.mxu0 }
 0x4ed   :  { %1915 = vmatmul.mubr.bf16.vlgmr.msra.gmra.mxu1 %v1292_v32 }
 0x4ee   :  { %v1897_v34 = vpop.f32.mrf.mxu0 }
 0x5ad   :  { %v1398_v36 = vpop.f32.mrf.mxu1 }
 0x5ae   :  { %v1399_v37 = vadd.f32 %v1577_v35, %v1398_v36 }
 0x5af   :  { %v1916_v38 = vpop.f32.mrf.mxu1 }
 0x5b0   :  { %v1405_v39 = vsel %vm1404_vm2, %v1399_v37, -inf }
 0x5b1   :  { %1406 = vmax.xlane.f32.xlu0 %v1405_v39  ;;  %v1401_v40 = vpop.f32.mrf.mxu1 }
 0x5b3   :  { %v1917_v41 = vpop.f32.mrf.mxu1 }
 0x63a   :  { %v1407_v42 = vpop.xlane.xlu0 %1406 }
 0x63b   :  { %v1408_v43 = vsub.f32 %v1399_v37, %v1407_v42 }
 0x63d   :  { %v1409_v44 = vmul.f32 1.442695, %v1408_v43 }
 0x63f   :  { %2001 = vpow2.f32 %v1409_v44 }
 0x64c   :  { %v2002_v45 = vpop.eup %2001 }
 0x64d   :  { %v1411_v46 = vsel %vm1404_vm2, %v2002_v45, 0.0 }
 0x64e   :  { %1412 = vadd.xlane.f32.xlu0 %v1411_v46 }
 0x6d7   :  { %v1413_v47 = vpop.xlane.xlu0 %1412 }
 0x6d8   :  { %2003 = vrcp.f32 %v1413_v47 }
 0x6e5   :  { %v2004_v48 = vpop.eup %2003 }
 0x6e6   :  { %v1415_v49 = vmul.f32 %v2004_v48, %v2002_v45 }
 0x6e8   :  { %1416 = vst [vmem:[#allocation2] sm:$0x3] %v1415_v49 }
 0x6e9   :  { %2016 = shalt.err (!%p2013_p4)
}
 0x6ea   :  { %1426 = dma.vmem_to_hbm [thread:$0]  %s1424_s8, 32, %s2504_s10, [#allocation3]  }
 0x6eb   :  { %2025 = dma.done.wait [#allocation3], 32  }
 0x6ec   :  { %2026 = vsyncadd [#allocation3], 4294967264 }
 0x6ed   :  { %1430 = vsyncpa [#allocation3], 1 }

</bundles_post_ra>
